<compile_context>
chip_gen: v7x
topology: tpu7x:2x2x1
jax: 0.10.0
libtpu: 0.0.40
codegen_flags: <defaults>
</compile_context>

<pallas_src>
import functools

import jax
import jax.numpy as jnp
from jax import lax
from jax.experimental import pallas as pl
from jax.experimental.pallas import tpu as pltpu

KH = KW = 4
STRIDE = 2
PAD = 1


def _round_up(x, m):
    return (x + m - 1) // m * m


# ----------------------------------------------------------------------------
# One-time weight packing (done at init, not per forward call)
# ----------------------------------------------------------------------------
def pack_cvi_weight(w):
    """(O, C, 4, 4) f32 -> (16, C, round_up(O,128)) bf16, tap-major layout."""
    O, C, kh, kw = w.shape
    assert (kh, kw) == (KH, KW)
    Op = _round_up(O, 128)                       # lane-dense output channels
    # tap index k = di*KW + dj ; per tap a (C, O) contraction matrix
    b = w.transpose(2, 3, 1, 0).reshape(kh * kw, C, O)
    b = jnp.zeros((kh * kw, C, Op), jnp.float32).at[:, :, :O].set(b)
    return b.astype(jnp.bfloat16)


def init_cvi_params(key, in_ch, out_ch):
    # weight_init('gaussian'): N(0, 0.02); Cvi default has bias=False.
    w = jax.random.normal(key, (out_ch, in_ch, KH, KW), jnp.float32) * 0.02
    return {"w": w, "w_packed": pack_cvi_weight(w)}


# ----------------------------------------------------------------------------
# Pallas kernel: in-kernel im2col gather + bf16 MXU matmuls, f32 accumulation
# ----------------------------------------------------------------------------
def _cvi_kernel(x_ref, w_ref, o_ref, *, Ho, Wo, C):
    # x_ref: (1, 4, Ho+1, Wo+1, C) f32  -- stride-2 phase-split, padded NHWC input
    # w_ref: (16, C, Op) bf16           -- one (C, Op) tap matrix per kernel offset
    # o_ref: (1, Ho*Wo, Op) f32
    acc = jnp.zeros(o_ref.shape[1:], jnp.float32)
    for di in range(KH):
        ro = di // 2
        for dj in range(KW):
            co = dj // 2
            phase = (di % 2) * 2 + (dj % 2)
            # Contiguous static window == the im2col rows for kernel tap (di, dj).
            piece = x_ref[0, phase, ro:ro + Ho, co:co + Wo, :]            # (Ho, Wo, C)
            # Layout-preserving collapse (Wo is a multiple of the 8-row sublane tile).
            a_mat = piece.reshape(Ho * Wo, C).astype(jnp.bfloat16)
            acc = acc + jnp.dot(a_mat, w_ref[di * KW + dj],
                                preferred_element_type=jnp.float32)
    o_ref[0] = acc


def cvi_forward(params, x):
    """x: (N, C, H, W) f32 -> (N, O, H/2, W/2) f32 (Conv2d k=4, s=2, p=1, no bias)."""
    w_packed = params["w_packed"]
    O = params["w"].shape[0]
    N, C, H, W = x.shape
    assert C == w_packed.shape[1], "channel mismatch"
    assert H % 2 == 0 and W % 2 == 0, "k=4, s=2, p=1 conv expects even H, W"
    Ho, Wo = H // 2, W // 2
    assert Wo % 8 == 0, "W must be a multiple of 16 for the in-kernel row collapse"
    Op = w_packed.shape[2]

    # One cheap layout pass (NCHW -> padded NHWC -> stride-2 phases); this is
    # 1x the input bytes vs. the 16x im2col expansion it replaces.
    xp = jnp.pad(x.transpose(0, 2, 3, 1), ((0, 0), (PAD, PAD), (PAD, PAD), (0, 0)))
    Hp, Wp = H + 2 * PAD, W + 2 * PAD
    xph = (xp.reshape(N, Hp // 2, 2, Wp // 2, 2, C)
             .transpose(0, 2, 4, 1, 3, 5)
             .reshape(N, 4, Hp // 2, Wp // 2, C))
    # xph[n, 2*a+b, i, j, c] == x_pad[n, 2*i+a, 2*j+b, c]; shape (N,4,Ho+1,Wo+1,C)

    kern = functools.partial(_cvi_kernel, Ho=Ho, Wo=Wo, C=C)
    out = pl.pallas_call(
        kern,
        out_shape=jax.ShapeDtypeStruct((N, Ho * Wo, Op), jnp.float32),
        grid=(N,),
        in_specs=[
            pl.BlockSpec((1, 4, Ho + 1, Wo + 1, C), lambda n: (n, 0, 0, 0, 0)),
            pl.BlockSpec((KH * KW, C, Op), lambda n: (0, 0, 0)),
        ],
        out_specs=pl.BlockSpec((1, Ho * Wo, Op), lambda n: (n, 0, 0)),
        compiler_params=pltpu.CompilerParams(
            dimension_semantics=("parallel",),
        ),
    )(xph, w_packed)

    out = out.reshape(N, Ho, Wo, Op)[:, :, :, :O]     # drop lane padding
    return out.transpose(0, 3, 1, 2)                  # back to PyTorch NCHW


# ----------------------------------------------------------------------------
# Plain-JAX reference (PyTorch Conv2d semantics) for validation
# ----------------------------------------------------------------------------
def cvi_reference(params, x):
    return lax.conv_general_dilated(
        x, params["w"], window_strides=(STRIDE, STRIDE),
        padding=((PAD, PAD), (PAD, PAD)),
        dimension_numbers=("NCHW", "OIHW", "NCHW"))


# ----------------------------------------------------------------------------
if __name__ == "__main__":
    key = jax.random.PRNGKey(0)
    wkey, xkey = jax.random.split(key)

    in_ch, out_ch = 4, 8
    N, H, W = 2, 16, 16
    params = init_cvi_params(wkey, in_ch, out_ch)
    x = jax.random.normal(xkey, (N, in_ch, H, W), jnp.float32)

    out = jax.jit(cvi_forward)(params, x)
    out = jax.block_until_ready(out)

    assert out.shape == (N, out_ch, H // 2, W // 2), out.shape
    assert out.dtype == jnp.float32
    assert bool(jnp.all(jnp.isfinite(out)))

    ref = cvi_reference(params, x)
    max_err = float(jnp.max(jnp.abs(out - ref)))
    assert bool(jnp.allclose(out, ref, atol=3e-2, rtol=3e-2)), max_err

    print("KERNEL_OK")
</pallas_src>

<mosaic_0001>
module attributes {stable_mosaic.version = 11 : i64} {
  func.func @_cvi_kernel(%arg0: i32, %arg1: memref<1x4x9x9x4xf32, #tpu.memory_space<vmem>>, %arg2: memref<16x4x128xbf16, #tpu.memory_space<vmem>>, %arg3: memref<1x64x128xf32, #tpu.memory_space<vmem>>) attributes {dimension_semantics = [#tpu.dimension_semantics<parallel>], iteration_bounds = array<i64: 2>, scalar_prefetch = 0 : i64, scratch_operands = 0 : i64, tpu.core_type = #tpu.core_type<tc>, window_params = [{transform_indices = @transform_0, window_bounds = array<i64: 1, 4, 9, 9, 4>}, {pipeline_mode = #tpu.pipeline_mode<synchronous>, transform_indices = @transform_1, window_bounds = array<i64: 16, 4, 128>}, {transform_indices = @transform_2, window_bounds = array<i64: 1, 64, 128>}]} {
    %cst = arith.constant 0.000000e+00 : f32
    %0 = vector.broadcast %cst : f32 to vector<64x128xf32>
    %c0 = arith.constant 0 : index
    %c0_0 = arith.constant 0 : index
    %c0_1 = arith.constant 0 : index
    %c0_2 = arith.constant 0 : index
    %c0_3 = arith.constant 0 : index
    %1 = vector.load %arg1[%c0, %c0_0, %c0_1, %c0_2, %c0_3] : memref<1x4x9x9x4xf32, #tpu.memory_space<vmem>>, vector<1x1x8x8x4xf32>
    %2 = vector.shape_cast %1 : vector<1x1x8x8x4xf32> to vector<8x8x4xf32>
    %3 = vector.shape_cast %2 : vector<8x8x4xf32> to vector<64x4xf32>
    %4 = arith.truncf %3 : vector<64x4xf32> to vector<64x4xbf16>
    %c0_4 = arith.constant 0 : index
    %c0_5 = arith.constant 0 : index
    %c0_6 = arith.constant 0 : index
    %5 = vector.load %arg2[%c0_4, %c0_5, %c0_6] : memref<16x4x128xbf16, #tpu.memory_space<vmem>>, vector<1x4x128xbf16>
    %6 = vector.shape_cast %5 : vector<1x4x128xbf16> to vector<4x128xbf16>
    %cst_7 = arith.constant dense<0.000000e+00> : vector<64x128xf32>
    %7 = tpu.matmul %4, %6, %cst_7 {dimension_numbers = #tpu.dot_dimension_numbers<[1], [0], [0], [1], [0, 0, 1, 1], [], []>} : vector<64x4xbf16>, vector<4x128xbf16>, vector<64x128xf32> -> vector<64x128xf32>
    %8 = arith.addf %0, %7 : vector<64x128xf32>
    %c0_8 = arith.constant 0 : index
    %c1 = arith.constant 1 : index
    %c0_9 = arith.constant 0 : index
    %c0_10 = arith.constant 0 : index
    %c0_11 = arith.constant 0 : index
    %9 = vector.load %arg1[%c0_8, %c1, %c0_9, %c0_10, %c0_11] : memref<1x4x9x9x4xf32, #tpu.memory_space<vmem>>, vector<1x1x8x8x4xf32>
    %10 = vector.shape_cast %9 : vector<1x1x8x8x4xf32> to vector<8x8x4xf32>
    %11 = vector.shape_cast %10 : vector<8x8x4xf32> to vector<64x4xf32>
    %12 = arith.truncf %11 : vector<64x4xf32> to vector<64x4xbf16>
    %c1_12 = arith.constant 1 : index
    %c0_13 = arith.constant 0 : index
    %c0_14 = arith.constant 0 : index
    %13 = vector.load %arg2[%c1_12, %c0_13, %c0_14] : memref<16x4x128xbf16, #tpu.memory_space<vmem>>, vector<1x4x128xbf16>
    %14 = vector.shape_cast %13 : vector<1x4x128xbf16> to vector<4x128xbf16>
    %cst_15 = arith.constant dense<0.000000e+00> : vector<64x128xf32>
    %15 = tpu.matmul %12, %14, %cst_15 {dimension_numbers = #tpu.dot_dimension_numbers<[1], [0], [0], [1], [0, 0, 1, 1], [], []>} : vector<64x4xbf16>, vector<4x128xbf16>, vector<64x128xf32> -> vector<64x128xf32>
    %16 = arith.addf %8, %15 : vector<64x128xf32>
    %c0_16 = arith.constant 0 : index
    %c0_17 = arith.constant 0 : index
    %c0_18 = arith.constant 0 : index
    %c1_19 = arith.constant 1 : index
    %c0_20 = arith.constant 0 : index
    %17 = vector.load %arg1[%c0_16, %c0_17, %c0_18, %c1_19, %c0_20] : memref<1x4x9x9x4xf32, #tpu.memory_space<vmem>>, vector<1x1x8x8x4xf32>
    %18 = vector.shape_cast %17 : vector<1x1x8x8x4xf32> to vector<8x8x4xf32>
    %19 = vector.shape_cast %18 : vector<8x8x4xf32> to vector<64x4xf32>
    %20 = arith.truncf %19 : vector<64x4xf32> to vector<64x4xbf16>
    %c2 = arith.constant 2 : index
    %c0_21 = arith.constant 0 : index
    %c0_22 = arith.constant 0 : index
    %21 = vector.load %arg2[%c2, %c0_21, %c0_22] : memref<16x4x128xbf16, #tpu.memory_space<vmem>>, vector<1x4x128xbf16>
    %22 = vector.shape_cast %21 : vector<1x4x128xbf16> to vector<4x128xbf16>
    %cst_23 = arith.constant dense<0.000000e+00> : vector<64x128xf32>
    %23 = tpu.matmul %20, %22, %cst_23 {dimension_numbers = #tpu.dot_dimension_numbers<[1], [0], [0], [1], [0, 0, 1, 1], [], []>} : vector<64x4xbf16>, vector<4x128xbf16>, vector<64x128xf32> -> vector<64x128xf32>
    %24 = arith.addf %16, %23 : vector<64x128xf32>
    %c0_24 = arith.constant 0 : index
    %c1_25 = arith.constant 1 : index
    %c0_26 = arith.constant 0 : index
    %c1_27 = arith.constant 1 : index
    %c0_28 = arith.constant 0 : index
    %25 = vector.load %arg1[%c0_24, %c1_25, %c0_26, %c1_27, %c0_28] : memref<1x4x9x9x4xf32, #tpu.memory_space<vmem>>, vector<1x1x8x8x4xf32>
    %26 = vector.shape_cast %25 : vector<1x1x8x8x4xf32> to vector<8x8x4xf32>
    %27 = vector.shape_cast %26 : vector<8x8x4xf32> to vector<64x4xf32>
    %28 = arith.truncf %27 : vector<64x4xf32> to vector<64x4xbf16>
    %c3 = arith.constant 3 : index
    %c0_29 = arith.constant 0 : index
    %c0_30 = arith.constant 0 : index
    %29 = vector.load %arg2[%c3, %c0_29, %c0_30] : memref<16x4x128xbf16, #tpu.memory_space<vmem>>, vector<1x4x128xbf16>
    %30 = vector.shape_cast %29 : vector<1x4x128xbf16> to vector<4x128xbf16>
    %cst_31 = arith.constant dense<0.000000e+00> : vector<64x128xf32>
    %31 = tpu.matmul %28, %30, %cst_31 {dimension_numbers = #tpu.dot_dimension_numbers<[1], [0], [0], [1], [0, 0, 1, 1], [], []>} : vector<64x4xbf16>, vector<4x128xbf16>, vector<64x128xf32> -> vector<64x128xf32>
    %32 = arith.addf %24, %31 : vector<64x128xf32>
    %c0_32 = arith.constant 0 : index
    %c2_33 = arith.constant 2 : index
    %c0_34 = arith.constant 0 : index
    %c0_35 = arith.constant 0 : index
    %c0_36 = arith.constant 0 : index
    %33 = vector.load %arg1[%c0_32, %c2_33, %c0_34, %c0_35, %c0_36] : memref<1x4x9x9x4xf32, #tpu.memory_space<vmem>>, vector<1x1x8x8x4xf32>
    %34 = vector.shape_cast %33 : vector<1x1x8x8x4xf32> to vector<8x8x4xf32>
    %35 = vector.shape_cast %34 : vector<8x8x4xf32> to vector<64x4xf32>
    %36 = arith.truncf %35 : vector<64x4xf32> to vector<64x4xbf16>
    %c4 = arith.constant 4 : index
    %c0_37 = arith.constant 0 : index
    %c0_38 = arith.constant 0 : index
    %37 = vector.load %arg2[%c4, %c0_37, %c0_38] : memref<16x4x128xbf16, #tpu.memory_space<vmem>>, vector<1x4x128xbf16>
    %38 = vector.shape_cast %37 : vector<1x4x128xbf16> to vector<4x128xbf16>
    %cst_39 = arith.constant dense<0.000000e+00> : vector<64x128xf32>
    %39 = tpu.matmul %36, %38, %cst_39 {dimension_numbers = #tpu.dot_dimension_numbers<[1], [0], [0], [1], [0, 0, 1, 1], [], []>} : vector<64x4xbf16>, vector<4x128xbf16>, vector<64x128xf32> -> vector<64x128xf32>
    %40 = arith.addf %32, %39 : vector<64x128xf32>
    %c0_40 = arith.constant 0 : index
    %c3_41 = arith.constant 3 : index
    %c0_42 = arith.constant 0 : index
    %c0_43 = arith.constant 0 : index
    %c0_44 = arith.constant 0 : index
    %41 = vector.load %arg1[%c0_40, %c3_41, %c0_42, %c0_43, %c0_44] : memref<1x4x9x9x4xf32, #tpu.memory_space<vmem>>, vector<1x1x8x8x4xf32>
    %42 = vector.shape_cast %41 : vector<1x1x8x8x4xf32> to vector<8x8x4xf32>
    %43 = vector.shape_cast %42 : vector<8x8x4xf32> to vector<64x4xf32>
    %44 = arith.truncf %43 : vector<64x4xf32> to vector<64x4xbf16>
    %c5 = arith.constant 5 : index
    %c0_45 = arith.constant 0 : index
    %c0_46 = arith.constant 0 : index
    %45 = vector.load %arg2[%c5, %c0_45, %c0_46] : memref<16x4x128xbf16, #tpu.memory_space<vmem>>, vector<1x4x128xbf16>
    %46 = vector.shape_cast %45 : vector<1x4x128xbf16> to vector<4x128xbf16>
    %cst_47 = arith.constant dense<0.000000e+00> : vector<64x128xf32>
    %47 = tpu.matmul %44, %46, %cst_47 {dimension_numbers = #tpu.dot_dimension_numbers<[1], [0], [0], [1], [0, 0, 1, 1], [], []>} : vector<64x4xbf16>, vector<4x128xbf16>, vector<64x128xf32> -> vector<64x128xf32>
    %48 = arith.addf %40, %47 : vector<64x128xf32>
    %c0_48 = arith.constant 0 : index
    %c2_49 = arith.constant 2 : index
    %c0_50 = arith.constant 0 : index
    %c1_51 = arith.constant 1 : index
    %c0_52 = arith.constant 0 : index
    %49 = vector.load %arg1[%c0_48, %c2_49, %c0_50, %c1_51, %c0_52] : memref<1x4x9x9x4xf32, #tpu.memory_space<vmem>>, vector<1x1x8x8x4xf32>
    %50 = vector.shape_cast %49 : vector<1x1x8x8x4xf32> to vector<8x8x4xf32>
    %51 = vector.shape_cast %50 : vector<8x8x4xf32> to vector<64x4xf32>
    %52 = arith.truncf %51 : vector<64x4xf32> to vector<64x4xbf16>
    %c6 = arith.constant 6 : index
    %c0_53 = arith.constant 0 : index
    %c0_54 = arith.constant 0 : index
    %53 = vector.load %arg2[%c6, %c0_53, %c0_54] : memref<16x4x128xbf16, #tpu.memory_space<vmem>>, vector<1x4x128xbf16>
    %54 = vector.shape_cast %53 : vector<1x4x128xbf16> to vector<4x128xbf16>
    %cst_55 = arith.constant dense<0.000000e+00> : vector<64x128xf32>
    %55 = tpu.matmul %52, %54, %cst_55 {dimension_numbers = #tpu.dot_dimension_numbers<[1], [0], [0], [1], [0, 0, 1, 1], [], []>} : vector<64x4xbf16>, vector<4x128xbf16>, vector<64x128xf32> -> vector<64x128xf32>
    %56 = arith.addf %48, %55 : vector<64x128xf32>
    %c0_56 = arith.constant 0 : index
    %c3_57 = arith.constant 3 : index
    %c0_58 = arith.constant 0 : index
    %c1_59 = arith.constant 1 : index
    %c0_60 = arith.constant 0 : index
    %57 = vector.load %arg1[%c0_56, %c3_57, %c0_58, %c1_59, %c0_60] : memref<1x4x9x9x4xf32, #tpu.memory_space<vmem>>, vector<1x1x8x8x4xf32>
    %58 = vector.shape_cast %57 : vector<1x1x8x8x4xf32> to vector<8x8x4xf32>
    %59 = vector.shape_cast %58 : vector<8x8x4xf32> to vector<64x4xf32>
    %60 = arith.truncf %59 : vector<64x4xf32> to vector<64x4xbf16>
    %c7 = arith.constant 7 : index
    %c0_61 = arith.constant 0 : index
    %c0_62 = arith.constant 0 : index
    %61 = vector.load %arg2[%c7, %c0_61, %c0_62] : memref<16x4x128xbf16, #tpu.memory_space<vmem>>, vector<1x4x128xbf16>
    %62 = vector.shape_cast %61 : vector<1x4x128xbf16> to vector<4x128xbf16>
    %cst_63 = arith.constant dense<0.000000e+00> : vector<64x128xf32>
    %63 = tpu.matmul %60, %62, %cst_63 {dimension_numbers = #tpu.dot_dimension_numbers<[1], [0], [0], [1], [0, 0, 1, 1], [], []>} : vector<64x4xbf16>, vector<4x128xbf16>, vector<64x128xf32> -> vector<64x128xf32>
    %64 = arith.addf %56, %63 : vector<64x128xf32>
    %c0_64 = arith.constant 0 : index
    %c0_65 = arith.constant 0 : index
    %c1_66 = arith.constant 1 : index
    %c0_67 = arith.constant 0 : index
    %c0_68 = arith.constant 0 : index
    %65 = vector.load %arg1[%c0_64, %c0_65, %c1_66, %c0_67, %c0_68] : memref<1x4x9x9x4xf32, #tpu.memory_space<vmem>>, vector<1x1x8x8x4xf32>
    %66 = vector.shape_cast %65 : vector<1x1x8x8x4xf32> to vector<8x8x4xf32>
    %67 = vector.shape_cast %66 : vector<8x8x4xf32> to vector<64x4xf32>
    %68 = arith.truncf %67 : vector<64x4xf32> to vector<64x4xbf16>
    %c8 = arith.constant 8 : index
    %c0_69 = arith.constant 0 : index
    %c0_70 = arith.constant 0 : index
    %69 = vector.load %arg2[%c8, %c0_69, %c0_70] : memref<16x4x128xbf16, #tpu.memory_space<vmem>>, vector<1x4x128xbf16>
    %70 = vector.shape_cast %69 : vector<1x4x128xbf16> to vector<4x128xbf16>
    %cst_71 = arith.constant dense<0.000000e+00> : vector<64x128xf32>
    %71 = tpu.matmul %68, %70, %cst_71 {dimension_numbers = #tpu.dot_dimension_numbers<[1], [0], [0], [1], [0, 0, 1, 1], [], []>} : vector<64x4xbf16>, vector<4x128xbf16>, vector<64x128xf32> -> vector<64x128xf32>
    %72 = arith.addf %64, %71 : vector<64x128xf32>
    %c0_72 = arith.constant 0 : index
    %c1_73 = arith.constant 1 : index
    %c1_74 = arith.constant 1 : index
    %c0_75 = arith.constant 0 : index
    %c0_76 = arith.constant 0 : index
    %73 = vector.load %arg1[%c0_72, %c1_73, %c1_74, %c0_75, %c0_76] : memref<1x4x9x9x4xf32, #tpu.memory_space<vmem>>, vector<1x1x8x8x4xf32>
    %74 = vector.shape_cast %73 : vector<1x1x8x8x4xf32> to vector<8x8x4xf32>
    %75 = vector.shape_cast %74 : vector<8x8x4xf32> to vector<64x4xf32>
    %76 = arith.truncf %75 : vector<64x4xf32> to vector<64x4xbf16>
    %c9 = arith.constant 9 : index
    %c0_77 = arith.constant 0 : index
    %c0_78 = arith.constant 0 : index
    %77 = vector.load %arg2[%c9, %c0_77, %c0_78] : memref<16x4x128xbf16, #tpu.memory_space<vmem>>, vector<1x4x128xbf16>
    %78 = vector.shape_cast %77 : vector<1x4x128xbf16> to vector<4x128xbf16>
    %cst_79 = arith.constant dense<0.000000e+00> : vector<64x128xf32>
    %79 = tpu.matmul %76, %78, %cst_79 {dimension_numbers = #tpu.dot_dimension_numbers<[1], [0], [0], [1], [0, 0, 1, 1], [], []>} : vector<64x4xbf16>, vector<4x128xbf16>, vector<64x128xf32> -> vector<64x128xf32>
    %80 = arith.addf %72, %79 : vector<64x128xf32>
    %c0_80 = arith.constant 0 : index
    %c0_81 = arith.constant 0 : index
    %c1_82 = arith.constant 1 : index
    %c1_83 = arith.constant 1 : index
    %c0_84 = arith.constant 0 : index
    %81 = vector.load %arg1[%c0_80, %c0_81, %c1_82, %c1_83, %c0_84] : memref<1x4x9x9x4xf32, #tpu.memory_space<vmem>>, vector<1x1x8x8x4xf32>
    %82 = vector.shape_cast %81 : vector<1x1x8x8x4xf32> to vector<8x8x4xf32>
    %83 = vector.shape_cast %82 : vector<8x8x4xf32> to vector<64x4xf32>
    %84 = arith.truncf %83 : vector<64x4xf32> to vector<64x4xbf16>
    %c10 = arith.constant 10 : index
    %c0_85 = arith.constant 0 : index
    %c0_86 = arith.constant 0 : index
    %85 = vector.load %arg2[%c10, %c0_85, %c0_86] : memref<16x4x128xbf16, #tpu.memory_space<vmem>>, vector<1x4x128xbf16>
    %86 = vector.shape_cast %85 : vector<1x4x128xbf16> to vector<4x128xbf16>
    %cst_87 = arith.constant dense<0.000000e+00> : vector<64x128xf32>
    %87 = tpu.matmul %84, %86, %cst_87 {dimension_numbers = #tpu.dot_dimension_numbers<[1], [0], [0], [1], [0, 0, 1, 1], [], []>} : vector<64x4xbf16>, vector<4x128xbf16>, vector<64x128xf32> -> vector<64x128xf32>
    %88 = arith.addf %80, %87 : vector<64x128xf32>
    %c0_88 = arith.constant 0 : index
    %c1_89 = arith.constant 1 : index
    %c1_90 = arith.constant 1 : index
    %c1_91 = arith.constant 1 : index
    %c0_92 = arith.constant 0 : index
    %89 = vector.load %arg1[%c0_88, %c1_89, %c1_90, %c1_91, %c0_92] : memref<1x4x9x9x4xf32, #tpu.memory_space<vmem>>, vector<1x1x8x8x4xf32>
    %90 = vector.shape_cast %89 : vector<1x1x8x8x4xf32> to vector<8x8x4xf32>
    %91 = vector.shape_cast %90 : vector<8x8x4xf32> to vector<64x4xf32>
    %92 = arith.truncf %91 : vector<64x4xf32> to vector<64x4xbf16>
    %c11 = arith.constant 11 : index
    %c0_93 = arith.constant 0 : index
    %c0_94 = arith.constant 0 : index
    %93 = vector.load %arg2[%c11, %c0_93, %c0_94] : memref<16x4x128xbf16, #tpu.memory_space<vmem>>, vector<1x4x128xbf16>
    %94 = vector.shape_cast %93 : vector<1x4x128xbf16> to vector<4x128xbf16>
    %cst_95 = arith.constant dense<0.000000e+00> : vector<64x128xf32>
    %95 = tpu.matmul %92, %94, %cst_95 {dimension_numbers = #tpu.dot_dimension_numbers<[1], [0], [0], [1], [0, 0, 1, 1], [], []>} : vector<64x4xbf16>, vector<4x128xbf16>, vector<64x128xf32> -> vector<64x128xf32>
    %96 = arith.addf %88, %95 : vector<64x128xf32>
    %c0_96 = arith.constant 0 : index
    %c2_97 = arith.constant 2 : index
    %c1_98 = arith.constant 1 : index
    %c0_99 = arith.constant 0 : index
    %c0_100 = arith.constant 0 : index
    %97 = vector.load %arg1[%c0_96, %c2_97, %c1_98, %c0_99, %c0_100] : memref<1x4x9x9x4xf32, #tpu.memory_space<vmem>>, vector<1x1x8x8x4xf32>
    %98 = vector.shape_cast %97 : vector<1x1x8x8x4xf32> to vector<8x8x4xf32>
    %99 = vector.shape_cast %98 : vector<8x8x4xf32> to vector<64x4xf32>
    %100 = arith.truncf %99 : vector<64x4xf32> to vector<64x4xbf16>
    %c12 = arith.constant 12 : index
    %c0_101 = arith.constant 0 : index
    %c0_102 = arith.constant 0 : index
    %101 = vector.load %arg2[%c12, %c0_101, %c0_102] : memref<16x4x128xbf16, #tpu.memory_space<vmem>>, vector<1x4x128xbf16>
    %102 = vector.shape_cast %101 : vector<1x4x128xbf16> to vector<4x128xbf16>
    %cst_103 = arith.constant dense<0.000000e+00> : vector<64x128xf32>
    %103 = tpu.matmul %100, %102, %cst_103 {dimension_numbers = #tpu.dot_dimension_numbers<[1], [0], [0], [1], [0, 0, 1, 1], [], []>} : vector<64x4xbf16>, vector<4x128xbf16>, vector<64x128xf32> -> vector<64x128xf32>
    %104 = arith.addf %96, %103 : vector<64x128xf32>
    %c0_104 = arith.constant 0 : index
    %c3_105 = arith.constant 3 : index
    %c1_106 = arith.constant 1 : index
    %c0_107 = arith.constant 0 : index
    %c0_108 = arith.constant 0 : index
    %105 = vector.load %arg1[%c0_104, %c3_105, %c1_106, %c0_107, %c0_108] : memref<1x4x9x9x4xf32, #tpu.memory_space<vmem>>, vector<1x1x8x8x4xf32>
    %106 = vector.shape_cast %105 : vector<1x1x8x8x4xf32> to vector<8x8x4xf32>
    %107 = vector.shape_cast %106 : vector<8x8x4xf32> to vector<64x4xf32>
    %108 = arith.truncf %107 : vector<64x4xf32> to vector<64x4xbf16>
    %c13 = arith.constant 13 : index
    %c0_109 = arith.constant 0 : index
    %c0_110 = arith.constant 0 : index
    %109 = vector.load %arg2[%c13, %c0_109, %c0_110] : memref<16x4x128xbf16, #tpu.memory_space<vmem>>, vector<1x4x128xbf16>
    %110 = vector.shape_cast %109 : vector<1x4x128xbf16> to vector<4x128xbf16>
    %cst_111 = arith.constant dense<0.000000e+00> : vector<64x128xf32>
    %111 = tpu.matmul %108, %110, %cst_111 {dimension_numbers = #tpu.dot_dimension_numbers<[1], [0], [0], [1], [0, 0, 1, 1], [], []>} : vector<64x4xbf16>, vector<4x128xbf16>, vector<64x128xf32> -> vector<64x128xf32>
    %112 = arith.addf %104, %111 : vector<64x128xf32>
    %c0_112 = arith.constant 0 : index
    %c2_113 = arith.constant 2 : index
    %c1_114 = arith.constant 1 : index
    %c1_115 = arith.constant 1 : index
    %c0_116 = arith.constant 0 : index
    %113 = vector.load %arg1[%c0_112, %c2_113, %c1_114, %c1_115, %c0_116] : memref<1x4x9x9x4xf32, #tpu.memory_space<vmem>>, vector<1x1x8x8x4xf32>
    %114 = vector.shape_cast %113 : vector<1x1x8x8x4xf32> to vector<8x8x4xf32>
    %115 = vector.shape_cast %114 : vector<8x8x4xf32> to vector<64x4xf32>
    %116 = arith.truncf %115 : vector<64x4xf32> to vector<64x4xbf16>
    %c14 = arith.constant 14 : index
    %c0_117 = arith.constant 0 : index
    %c0_118 = arith.constant 0 : index
    %117 = vector.load %arg2[%c14, %c0_117, %c0_118] : memref<16x4x128xbf16, #tpu.memory_space<vmem>>, vector<1x4x128xbf16>
    %118 = vector.shape_cast %117 : vector<1x4x128xbf16> to vector<4x128xbf16>
    %cst_119 = arith.constant dense<0.000000e+00> : vector<64x128xf32>
    %119 = tpu.matmul %116, %118, %cst_119 {dimension_numbers = #tpu.dot_dimension_numbers<[1], [0], [0], [1], [0, 0, 1, 1], [], []>} : vector<64x4xbf16>, vector<4x128xbf16>, vector<64x128xf32> -> vector<64x128xf32>
    %120 = arith.addf %112, %119 : vector<64x128xf32>
    %c0_120 = arith.constant 0 : index
    %c3_121 = arith.constant 3 : index
    %c1_122 = arith.constant 1 : index
    %c1_123 = arith.constant 1 : index
    %c0_124 = arith.constant 0 : index
    %121 = vector.load %arg1[%c0_120, %c3_121, %c1_122, %c1_123, %c0_124] : memref<1x4x9x9x4xf32, #tpu.memory_space<vmem>>, vector<1x1x8x8x4xf32>
    %122 = vector.shape_cast %121 : vector<1x1x8x8x4xf32> to vector<8x8x4xf32>
    %123 = vector.shape_cast %122 : vector<8x8x4xf32> to vector<64x4xf32>
    %124 = arith.truncf %123 : vector<64x4xf32> to vector<64x4xbf16>
    %c15 = arith.constant 15 : index
    %c0_125 = arith.constant 0 : index
    %c0_126 = arith.constant 0 : index
    %125 = vector.load %arg2[%c15, %c0_125, %c0_126] : memref<16x4x128xbf16, #tpu.memory_space<vmem>>, vector<1x4x128xbf16>
    %126 = vector.shape_cast %125 : vector<1x4x128xbf16> to vector<4x128xbf16>
    %cst_127 = arith.constant dense<0.000000e+00> : vector<64x128xf32>
    %127 = tpu.matmul %124, %126, %cst_127 {dimension_numbers = #tpu.dot_dimension_numbers<[1], [0], [0], [1], [0, 0, 1, 1], [], []>} : vector<64x4xbf16>, vector<4x128xbf16>, vector<64x128xf32> -> vector<64x128xf32>
    %128 = arith.addf %120, %127 : vector<64x128xf32>
    %c0_128 = arith.constant 0 : index
    %c0_129 = arith.constant 0 : index
    %c0_130 = arith.constant 0 : index
    %129 = vector.load %arg3[%c0_128, %c0_129, %c0_130] : memref<1x64x128xf32, #tpu.memory_space<vmem>>, vector<1x64x128xf32>
    %130 = vector.shape_cast %129 : vector<1x64x128xf32> to vector<64x128xf32>
    %131 = vector.shape_cast %128 : vector<64x128xf32> to vector<1x64x128xf32>
    tpu.vector_store %arg3[%c0_128, %c0_129, %c0_130], %131 {strides = array<i32>} : memref<1x64x128xf32, #tpu.memory_space<vmem>>, vector<1x64x128xf32>,
    return
  }
  func.func @transform_0(%arg0: i32) -> (i32, i32, i32, i32, i32) {
    %c0_i32 = arith.constant 0 : i32
    %c0_i32_0 = arith.constant 0 : i32
    %c0_i32_1 = arith.constant 0 : i32
    %c0_i32_2 = arith.constant 0 : i32
    %c0_i32_3 = arith.constant 0 : i32
    return %arg0, %c0_i32, %c0_i32_0, %c0_i32_1, %c0_i32_2 : i32, i32, i32, i32, i32
  }
  func.func @transform_1(%arg0: i32) -> (i32, i32, i32) {
    %c0_i32 = arith.constant 0 : i32
    %c0_i32_0 = arith.constant 0 : i32
    %c0_i32_1 = arith.constant 0 : i32
    %c0_i32_2 = arith.constant 0 : i32
    return %c0_i32, %c0_i32_0, %c0_i32_1 : i32, i32, i32
  }
  func.func @transform_2(%arg0: i32) -> (i32, i32, i32) {
    %c0_i32 = arith.constant 0 : i32
    %c0_i32_0 = arith.constant 0 : i32
    %c0_i32_1 = arith.constant 0 : i32
    return %arg0, %c0_i32, %c0_i32_0 : i32, i32, i32
  }
}

</mosaic_0001>

<bundles_post_ra>
// kernel: cvi_forward.1
= control target key start
LH: loop header
LB: loop body
LE: loop exit
PB: predicated region body
PF: predicated region fallthrough
CT: control target
= control target key end

     0   :  { %s2442_s9 = smov 0   ;;  %s2691_s0 = inlined_call_operand.vmem [shape: f32[2,4,9,9,4], index: 0, kind: input, shape index: {}]   ;;  %s2692_s1 = inlined_call_operand.vmem [shape: bf16[16,4,128], index: 1, kind: input, shape index: {}]   ;;  %s2693_s2 = inlined_call_operand.vmem [shape: f32[2,64,128], index: 2, kind: output, shape index: {}]  }
   0x1 LB: > { %s1832_s10 = sadd.s32 4294967295, %s2425_s9   ;;  %p1836_p0 = scmp.ge.s32.totalorder %s2425_s9, 1  ;;  %s2425_s9 = sphi %s2442_s9, %s12_s9  }
   0x2   : > { %p112_p1 = scmp.lt.s32.totalorder %s2425_s9, 3 }
   0x4   : > { %p113_p2 = pnand %p1836_p0, %p112_p1 }
   0x5   : > { %v1848_v0 = vld [vmem:[%s2692_s1 + $0x2] sm:$0x3] (!%p113_p2)  ;;  %vm186_vm0 = vcmask (!%p113_p2), 1041408   ;;  %v1935_v1 = vld [vmem:[%s2692_s1 + $0x10] sm:$0x3] (!%p113_p2)  ;;  %p134_p3 = scmp.lt.s32.totalorder (!%p113_p2), %s1832_s10, 1 }
   0x6   : > { %116 = sbr.rel (%p113_p2) target bundleno = 361 (0x169), region = 28  ;;  %2394 = vmatprep.subr.msk.bf16.mxu1 (!%p113_p2), %vm186_vm0, %v1848_v0  ;;  %2402 = vmatprep.subr.msk.bf16.mxu0 (!%p113_p2), %vm186_vm0, %v1935_v1  ;;  %v188_v2 = vsel (!%p113_p2), %vm186_vm0, %v1848_v0, 0  ;;  %v977_v3 = vsel (!%p113_p2), %vm186_vm0, %v1935_v1, 0  ;;  %v157_v4 = vld [vmem:[%s2692_s1] sm:$0x3] (!%p113_p2)  ;;  %vm173_vm1 = vcmask (!%p113_p2), 31744  }
   0x7   : > { %2115 = vmatpush3.bf16.msra.mxu1 (!%p113_p2), %v188_v2  ;;  %2195 = vmatpush3.bf16.msra.mxu0 (!%p113_p2), %v977_v3  ;;  %v1948_v5 = vld [vmem:[%s2692_s1 + $0x12] sm:$0x3] (!%p113_p2)  ;;  %v268_v15 = vsel (!%p113_p2), %vm186_vm0, %v157_v4, 0  ;;  %v1857_v26 = vld [vmem:[%s2692_s1 + $0x4] sm:$0x3] (!%p113_p2) }
   0x8   : > { %2395 = vmatprep.subr.msk.bf16.mxu1 (!%p113_p2), %vm186_vm0, %v157_v4  ;;  %2403 = vmatprep.subr.msk.bf16.mxu0 (!%p113_p2), %vm186_vm0, %v1948_v5  ;;  %v1080_v20 = vsel (!%p113_p2), %vm186_vm0, %v1948_v5, 0  ;;  %v1961_v29 = vld [vmem:[%s2692_s1 + $0x14] sm:$0x3] (!%p113_p2)  ;;  %v362_v39 = vsel (!%p113_p2), %vm186_vm0, %v1857_v26, 0  ;;  %v1870_v43 = vld [vmem:[%s2692_s1 + $0x6] sm:$0x3] (!%p113_p2) }
   0x9   : > { %v1182_v41 = vsel (!%p113_p2), %vm186_vm0, %v1961_v29, 0  ;;  %v1974_v44 = vld [vmem:[%s2692_s1 + $0x16] sm:$0x3] (!%p113_p2)  ;;  %v464_v59 = vsel (!%p113_p2), %vm186_vm0, %v1870_v43, 0  ;;  %v1883_v63 = vld [vmem:[%s2692_s1 + $0x8] sm:$0x3] (!%p113_p2) }
   0xa   : > { %v1284_v61 = vsel (!%p113_p2), %vm186_vm0, %v1974_v44, 0  ;;  %v1987_v1 = vld [vmem:[%s2692_s1 + $0x18] sm:$0x3] (!%p113_p2) }
   0xd   : > { %s2695_s10 = smov (!%p134_p3, %s1832_s10), 1 }
   0xe   : > { %s2410_s19 = smul.u32 576, %s2695_s10  ;;  %s2033_s21 = sshll.u32 %s2695_s10, 6 }
   0xf   : > { %s2678_s25 = scalar_lea.vmem %s2693_s2, %s2033_s21 }
  0x10   : > { %s2474_s22 = scalar_lea.vmem %s2691_s0, %s2410_s19 }
  0x11   : > { %v1840_v6 = vld [vmem:[%s2474_s22 + $0x90] sm:$0xff]  ;;  %v1841_v7 = vld [vmem:[%s2474_s22 + $0xa0] sm:$0xff] }
  0x12   : > { %v1927_v8 = vld [vmem:[%s2474_s22 + $0x10] sm:$0xff]  ;;  %v167_v9 = vpack.c.bf16 %v1841_v7, %v1840_v6  ;;  %v1928_v10 = vld [vmem:[%s2474_s22 + $0x20] sm:$0xff] }
  0x13   : > { %v1842_v11 = vld [vmem:[%s2474_s22 + $0xb0] sm:$0xff]  ;;  %v1843_v12 = vld [vmem:[%s2474_s22 + $0xc0] sm:$0xff]  ;;  %v958_v13 = vpack.c.bf16 %v1928_v10, %v1927_v8 }
  0x14   : > { %v168_v14 = vpack.c.bf16 %v1843_v12, %v1842_v11  ;;  %v1929_v16 = vld [vmem:[%s2474_s22 + $0x30] sm:$0xff]  ;;  %v1930_v17 = vld [vmem:[%s2474_s22 + $0x40] sm:$0xff]  ;;  %2116 = vmatprep.mubr.msk.bf16.mxu1 %vm173_vm1, %v167_v9  ;;  %v1061_v36 = vpack.c.bf16 %v1842_v11, %v1841_v7 }
  0x15   : > { %v1844_v18 = vld [vmem:[%s2474_s22 + $0xd0] sm:$0xff]  ;;  %v959_v19 = vpack.c.bf16 %v1930_v17, %v1929_v16  ;;  %v1845_v21 = vld [vmem:[%s2474_s22 + $0xe0] sm:$0xff]  ;;  %2196 = vmatprep.mubr.msk.bf16.mxu0 %vm173_vm1, %v958_v13  ;;  %v154_v37 = vpack.c.bf16 %v1929_v16, %v1928_v10  ;;  %v567_v16 = vsel %vm186_vm0, %v1883_v63, 0 }
  0x16   : > { %v1931_v22 = vld [vmem:[%s2474_s22 + $0x50] sm:$0xff]  ;;  %v1932_v23 = vld [vmem:[%s2474_s22 + $0x60] sm:$0xff]  ;;  %2117 = vmatmul.mubr.msk.bf16.vlgmr.msra.gmra.mrb[0].mxu1 %vm173_vm1, %v168_v14  ;;  %v169_v24 = vpack.c.bf16 %v1845_v21, %v1844_v18  ;;  %v1062_v38 = vpack.c.bf16 %v1844_v18, %v1843_v12  ;;  %v1387_v18 = vsel %vm186_vm0, %v1987_v1, 0 }
  0x17   : > { %v960_v25 = vpack.c.bf16 %v1932_v23, %v1931_v22  ;;  %2125 = vmatpush3.bf16.msra.mxu1 %v268_v15  ;;  %2197 = vmatmul.mubr.msk.bf16.vlgmr.msra.gmra.mrb[0].mxu0 %vm173_vm1, %v959_v19  ;;  %v1846_v27 = vld [vmem:[%s2474_s22 + $0xf0] sm:$0xff]  ;;  %v1847_v28 = vld [vmem:[%s2474_s22 + $0x100] sm:$0xff]  ;;  %v155_v40 = vpack.c.bf16 %v1931_v22, %v1930_v17  ;;  %v2000_v22 = vld [vmem:[%s2692_s1 + $0x1a] sm:$0x3] }
  0x18   : > { %2205 = vmatpush3.bf16.msra.mxu0 %v1080_v20  ;;  %2120 = vmatprep.mubr.msk.bf16.mxu1 %vm173_vm1, %v169_v24  ;;  %v1933_v30 = vld [vmem:[%s2474_s22 + $0x70] sm:$0xff]  ;;  %v1934_v31 = vld [vmem:[%s2474_s22 + $0x80] sm:$0xff]  ;;  %v170_v33 = vpack.c.bf16 %v1847_v28, %v1846_v27  ;;  %v1063_v42 = vpack.c.bf16 %v1846_v27, %v1845_v21  ;;  %v1896_v20 = vld [vmem:[%s2692_s1 + $0xa] sm:$0x3] }
  0x19   : > { %v145_v32 = vld [vmem:[%s2474_s22] sm:$0xff]  ;;  %2200 = vmatprep.mubr.msk.bf16.mxu0 %vm173_vm1, %v960_v25  ;;  %2396 = vmatprep.subr.msk.bf16.mxu1 %vm186_vm0, %v1857_v26  ;;  %v961_v34 = vpack.c.bf16 %v1934_v31, %v1933_v30  ;;  %v1947_v45 = vld [vmem:[%s2474_s22 + $0x110] sm:$0xff]  ;;  %v156_v49 = vpack.c.bf16 %v1933_v30, %v1932_v23 }
  0x1a   : > { %2404 = vmatprep.subr.msk.bf16.mxu0 %vm186_vm0, %v1961_v29  ;;  %v153_v35 = vpack.c.bf16 %v1927_v8, %v145_v32  ;;  %v335_v46 = vld [vmem:[%s2474_s22 + $0x1] sm:$0xff]  ;;  %v336_v47 = vld [vmem:[%s2474_s22 + $0x11] sm:$0xff]  ;;  %v1064_v50 = vpack.c.bf16 %v1947_v45, %v1847_v28 }
  0x1b   : > { %v1954_v48 = vld [vmem:[%s2474_s22 + $0x21] sm:$0xff]  ;;  %v343_v51 = vpack.c.bf16 %v336_v47, %v335_v46  ;;  %v338_v53 = vld [vmem:[%s2474_s22 + $0x31] sm:$0xff] }
  0x1c   : > { %v1163_v52 = vpack.c.bf16 %v1954_v48, %v336_v47  ;;  %v1956_v54 = vld [vmem:[%s2474_s22 + $0x41] sm:$0xff]  ;;  %v340_v55 = vld [vmem:[%s2474_s22 + $0x51] sm:$0xff]  ;;  %v344_v56 = vpack.c.bf16 %v338_v53, %v1954_v48 }
  0x1d   : > { %v1958_v57 = vld [vmem:[%s2474_s22 + $0x61] sm:$0xff]  ;;  %v1164_v58 = vpack.c.bf16 %v1956_v54, %v338_v53  ;;  %v345_v60 = vpack.c.bf16 %v340_v55, %v1956_v54  ;;  %v342_v0 = vld [vmem:[%s2474_s22 + $0x71] sm:$0xff] }
  0x1e   : > { %2121 = vmatmul.mubr.msk.bf16.gmra.mrb[4].mxu1 %vm173_vm1, %v170_v33  ;;  %v1165_v62 = vpack.c.bf16 %v1958_v57, %v340_v55  ;;  %v1960_v2 = vld [vmem:[%s2474_s22 + $0x81] sm:$0xff]  ;;  %v1862_v3 = vld [vmem:[%s2474_s22 + $0x91] sm:$0xff]  ;;  %v346_v6 = vpack.c.bf16 %v342_v0, %v1958_v57 }
  0x1f   : > { %2201 = vmatmul.mubr.msk.bf16.gmra.mrb[4].mxu0 %vm173_vm1, %v961_v34  ;;  %2126 = vmatprep.mubr.msk.bf16.mxu1 %vm173_vm1, %v153_v35  ;;  %v1863_v4 = vld [vmem:[%s2474_s22 + $0xa1] sm:$0xff]  ;;  %v1967_v5 = vld [vmem:[%s2474_s22 + $0xb1] sm:$0xff]  ;;  %v1166_v7 = vpack.c.bf16 %v1960_v2, %v342_v0  ;;  %v2026_v0 = vld [vmem:[%s2692_s1 + $0x1e] sm:$0x3] }
  0x20   : > { %2206 = vmatprep.mubr.msk.bf16.mxu0 %vm173_vm1, %v1061_v36  ;;  %v445_v8 = vpack.c.bf16 %v1863_v4, %v1862_v3  ;;  %v1265_v9 = vpack.c.bf16 %v1967_v5, %v1863_v4  ;;  %v1865_v10 = vld [vmem:[%s2474_s22 + $0xc1] sm:$0xff]  ;;  %v1969_v11 = vld [vmem:[%s2474_s22 + $0xd1] sm:$0xff] }
  0x21   : > { %v1867_v12 = vld [vmem:[%s2474_s22 + $0xe1] sm:$0xff]  ;;  %v446_v13 = vpack.c.bf16 %v1865_v10, %v1967_v5  ;;  %v1971_v14 = vld [vmem:[%s2474_s22 + $0xf1] sm:$0xff]  ;;  %v1266_v15 = vpack.c.bf16 %v1969_v11, %v1865_v10 }
  0x22   : > { %v447_v17 = vpack.c.bf16 %v1867_v12, %v1969_v11  ;;  %v1267_v19 = vpack.c.bf16 %v1971_v14, %v1867_v12  ;;  %v1869_v21 = vld [vmem:[%s2474_s22 + $0x101] sm:$0xff]  ;;  %v1973_v23 = vld [vmem:[%s2474_s22 + $0x111] sm:$0xff] }
  0x23   : > { %v1875_v24 = vld [vmem:[%s2474_s22 + $0x120] sm:$0xff]  ;;  %v1876_v25 = vld [vmem:[%s2474_s22 + $0x130] sm:$0xff]  ;;  %v448_v27 = vpack.c.bf16 %v1869_v21, %v1971_v14  ;;  %v1268_v28 = vpack.c.bf16 %v1973_v23, %v1869_v21 }
  0x24   : > { %v1980_v26 = vld [vmem:[%s2474_s22 + $0x140] sm:$0xff]  ;;  %v548_v29 = vpack.c.bf16 %v1876_v25, %v1875_v24  ;;  %v1878_v31 = vld [vmem:[%s2474_s22 + $0x150] sm:$0xff] }
  0x25   : > { %v1368_v30 = vpack.c.bf16 %v1980_v26, %v1876_v25  ;;  %v1982_v32 = vld [vmem:[%s2474_s22 + $0x160] sm:$0xff]  ;;  %v1880_v33 = vld [vmem:[%s2474_s22 + $0x170] sm:$0xff]  ;;  %v549_v34 = vpack.c.bf16 %v1878_v31, %v1980_v26 }
  0x26   : > { %2127 = vmatmul.mubr.msk.bf16.vlgmr.msra.gmra.mrb[0].mxu1 %vm173_vm1, %v154_v37  ;;  %v1984_v35 = vld [vmem:[%s2474_s22 + $0x180] sm:$0xff]  ;;  %v1369_v36 = vpack.c.bf16 %v1982_v32, %v1878_v31  ;;  %v670_v37 = vsel %vm186_vm0, %v1896_v20, 0  ;;  %v1888_v45 = vld [vmem:[%s2474_s22 + $0x1b0] sm:$0xff] }
  0x27   : > { %2135 = vmatpush3.bf16.msra.mxu1 %v362_v39  ;;  %2207 = vmatmul.mubr.msk.bf16.vlgmr.msra.gmra.mrb[0].mxu0 %vm173_vm1, %v1062_v38  ;;  %v550_v38 = vpack.c.bf16 %v1880_v33, %v1982_v32  ;;  %v1490_v39 = vsel %vm186_vm0, %v2000_v22, 0  ;;  %v1889_v46 = vld [vmem:[%s2474_s22 + $0x1c0] sm:$0xff]  ;;  %v1993_v47 = vld [vmem:[%s2474_s22 + $0x1d0] sm:$0xff] }
  0x28   : > { %2215 = vmatpush3.bf16.msra.mxu0 %v1182_v41  ;;  %2130 = vmatprep.mubr.msk.bf16.mxu1 %vm173_vm1, %v155_v40  ;;  %v1370_v40 = vpack.c.bf16 %v1984_v35, %v1880_v33  ;;  %v1909_v41 = vld [vmem:[%s2692_s1 + $0xc] sm:$0x3]  ;;  %v1995_v53 = vld [vmem:[%s2474_s22 + $0x1f0] sm:$0xff]  ;;  %v1893_v54 = vld [vmem:[%s2474_s22 + $0x200] sm:$0xff] }
  0x29   : > { %2210 = vmatprep.mubr.msk.bf16.mxu0 %vm173_vm1, %v1063_v42  ;;  %2397 = vmatprep.subr.msk.bf16.mxu1 %vm186_vm0, %v1870_v43  ;;  %v1882_v42 = vld [vmem:[%s2474_s22 + $0x190] sm:$0xff]  ;;  %v2013_v43 = vld [vmem:[%s2692_s1 + $0x1c] sm:$0x3]  ;;  %v1901_v2 = vld [vmem:[%s2474_s22 + $0x121] sm:$0xff] }
  0x2a   : > { %2405 = vmatprep.subr.msk.bf16.mxu0 %vm186_vm0, %v1974_v44  ;;  %v1986_v44 = vld [vmem:[%s2474_s22 + $0x1a0] sm:$0xff]  ;;  %v551_v48 = vpack.c.bf16 %v1882_v42, %v1984_v35  ;;  %v1902_v3 = vld [vmem:[%s2474_s22 + $0x131] sm:$0xff] }
  0x2b   : > { %v2006_v4 = vld [vmem:[%s2474_s22 + $0x141] sm:$0xff]  ;;  %v1906_v11 = vld [vmem:[%s2474_s22 + $0x171] sm:$0xff] }
  0x2c   : > { %v2008_v10 = vld [vmem:[%s2474_s22 + $0x161] sm:$0xff]  ;;  %v1914_v21 = vld [vmem:[%s2474_s22 + $0x1b1] sm:$0xff] }
  0x2d   : > { %v2019_v23 = vld [vmem:[%s2474_s22 + $0x1d1] sm:$0xff] }
  0x2e   : > { %2131 = vmatmul.mubr.msk.bf16.gmra.mrb[4].mxu1 %vm173_vm1, %v156_v49  ;;  %v1371_v49 = vpack.c.bf16 %v1986_v44, %v1882_v42  ;;  %v2023_v31 = vld [vmem:[%s2474_s22 + $0x211] sm:$0xff] }
  0x2f   : > { %2211 = vmatmul.mubr.msk.bf16.gmra.mrb[4].mxu0 %vm173_vm1, %v1064_v50  ;;  %2136 = vmatprep.mubr.msk.bf16.mxu1 %vm173_vm1, %v343_v51  ;;  %v651_v50 = vpack.c.bf16 %v1889_v46, %v1888_v45  ;;  %v1471_v51 = vpack.c.bf16 %v1993_v47, %v1889_v46 }
  0x30   : > { %2216 = vmatprep.mubr.msk.bf16.mxu0 %vm173_vm1, %v1163_v52  ;;  %v1891_v52 = vld [vmem:[%s2474_s22 + $0x1e0] sm:$0xff] }
  0x31   : > { %v652_v55 = vpack.c.bf16 %v1891_v52, %v1993_v47  ;;  %v1472_v57 = vpack.c.bf16 %v1995_v53, %v1891_v52 }
  0x36   : > { %2137 = vmatmul.mubr.msk.bf16.vlgmr.msra.gmra.mrb[0].mxu1 %vm173_vm1, %v344_v56  ;;  %v1997_v56 = vld [vmem:[%s2474_s22 + $0x210] sm:$0xff] }
  0x37   : > { %2145 = vmatpush3.bf16.msra.mxu1 %v464_v59  ;;  %2217 = vmatmul.mubr.msk.bf16.vlgmr.msra.gmra.mrb[0].mxu0 %vm173_vm1, %v1164_v58  ;;  %v772_v58 = vsel %vm186_vm0, %v1909_v41, 0  ;;  %v653_v59 = vpack.c.bf16 %v1893_v54, %v1995_v53 }
  0x38   : > { %2225 = vmatpush3.bf16.msra.mxu0 %v1284_v61  ;;  %2140 = vmatprep.mubr.msk.bf16.mxu1 %vm173_vm1, %v345_v60  ;;  %v1592_v60 = vsel %vm186_vm0, %v2013_v43, 0  ;;  %v1473_v61 = vpack.c.bf16 %v1997_v56, %v1893_v54 }
  0x39   : > { %2220 = vmatprep.mubr.msk.bf16.mxu0 %vm173_vm1, %v1165_v62  ;;  %2398 = vmatprep.subr.msk.bf16.mxu1 %vm186_vm0, %v1883_v63  ;;  %v1922_v62 = vld [vmem:[%s2692_s1 + $0xe] sm:$0x3]  ;;  %v1895_v63 = vld [vmem:[%s2474_s22 + $0x220] sm:$0xff] }
  0x3a   : > { %2406 = vmatprep.subr.msk.bf16.mxu0 %vm186_vm0, %v1987_v1  ;;  %v1999_v1 = vld [vmem:[%s2474_s22 + $0x230] sm:$0xff]  ;;  %v654_v5 = vpack.c.bf16 %v1895_v63, %v1997_v56 }
  0x3e   : > { %2141 = vmatmul.mubr.msk.bf16.gmra.mrb[4].mxu1 %vm173_vm1, %v346_v6  ;;  %v1474_v6 = vpack.c.bf16 %v1999_v1, %v1895_v63 }
  0x3f   : > { %2221 = vmatmul.mubr.msk.bf16.gmra.mrb[4].mxu0 %vm173_vm1, %v1166_v7  ;;  %2146 = vmatprep.mubr.msk.bf16.mxu1 %vm173_vm1, %v445_v8  ;;  %v753_v7 = vpack.c.bf16 %v1902_v3, %v1901_v2  ;;  %v1573_v8 = vpack.c.bf16 %v2006_v4, %v1902_v3 }
  0x40   : > { %2226 = vmatprep.mubr.msk.bf16.mxu0 %vm173_vm1, %v1265_v9  ;;  %v1904_v9 = vld [vmem:[%s2474_s22 + $0x151] sm:$0xff] }
  0x41   : > { %v754_v12 = vpack.c.bf16 %v1904_v9, %v2006_v4  ;;  %v1574_v14 = vpack.c.bf16 %v2008_v10, %v1904_v9 }
  0x46   : > { %2147 = vmatmul.mubr.msk.bf16.vlgmr.msra.gmra.mrb[0].mxu1 %vm173_vm1, %v446_v13  ;;  %v2010_v13 = vld [vmem:[%s2474_s22 + $0x181] sm:$0xff] }
  0x47   : > { %2155 = vmatpush3.bf16.msra.mxu1 %v567_v16  ;;  %2227 = vmatmul.mubr.msk.bf16.vlgmr.msra.gmra.mrb[0].mxu0 %vm173_vm1, %v1266_v15  ;;  %v874_v15 = vsel %vm186_vm0, %v1922_v62, 0  ;;  %v755_v16 = vpack.c.bf16 %v1906_v11, %v2008_v10 }
  0x48   : > { %2235 = vmatpush3.bf16.msra.mxu0 %v1387_v18  ;;  %2150 = vmatprep.mubr.msk.bf16.mxu1 %vm173_vm1, %v447_v17  ;;  %v1694_v17 = vsel %vm186_vm0, %v2026_v0, 0  ;;  %v1575_v18 = vpack.c.bf16 %v2010_v13, %v1906_v11 }
  0x49   : > { %2230 = vmatprep.mubr.msk.bf16.mxu0 %vm173_vm1, %v1267_v19  ;;  %2399 = vmatprep.subr.msk.bf16.mxu1 %vm186_vm0, %v1896_v20  ;;  %v1908_v19 = vld [vmem:[%s2474_s22 + $0x191] sm:$0xff]  ;;  %v2012_v20 = vld [vmem:[%s2474_s22 + $0x1a1] sm:$0xff] }
  0x4a   : > { %2407 = vmatprep.subr.msk.bf16.mxu0 %vm186_vm0, %v2000_v22  ;;  %v1915_v22 = vld [vmem:[%s2474_s22 + $0x1c1] sm:$0xff]  ;;  %v756_v24 = vpack.c.bf16 %v1908_v19, %v2010_v13  ;;  %v1576_v25 = vpack.c.bf16 %v2012_v20, %v1908_v19 }
  0x4b   : > { %v855_v26 = vpack.c.bf16 %v1915_v22, %v1914_v21 }
  0x4e   : > { %2151 = vmatmul.mubr.msk.bf16.gmra.mrb[4].mxu1 %vm173_vm1, %v448_v27  ;;  %v1675_v27 = vpack.c.bf16 %v2019_v23, %v1915_v22 }
  0x4f   : > { %2231 = vmatmul.mubr.msk.bf16.gmra.mrb[4].mxu0 %vm173_vm1, %v1268_v28  ;;  %2156 = vmatprep.mubr.msk.bf16.mxu1 %vm173_vm1, %v548_v29  ;;  %v1917_v28 = vld [vmem:[%s2474_s22 + $0x1e1] sm:$0xff]  ;;  %v2021_v29 = vld [vmem:[%s2474_s22 + $0x1f1] sm:$0xff] }
  0x50   : > { %2236 = vmatprep.mubr.msk.bf16.mxu0 %vm173_vm1, %v1368_v30  ;;  %v1919_v30 = vld [vmem:[%s2474_s22 + $0x201] sm:$0xff]  ;;  %v856_v32 = vpack.c.bf16 %v1917_v28, %v2019_v23  ;;  %v1676_v33 = vpack.c.bf16 %v2021_v29, %v1917_v28 }
  0x51   : > { %v1677_v35 = vpack.c.bf16 %v2023_v31, %v1919_v30 }
  0x56   : > { %2157 = vmatmul.mubr.msk.bf16.vlgmr.msra.gmra.mrb[0].mxu1 %vm173_vm1, %v549_v34  ;;  %v857_v34 = vpack.c.bf16 %v1919_v30, %v2021_v29 }
  0x57   : > { %2165 = vmatpush3.bf16.msra.mxu1 %v670_v37  ;;  %2237 = vmatmul.mubr.msk.bf16.vlgmr.msra.gmra.mrb[0].mxu0 %vm173_vm1, %v1369_v36  ;;  %v1921_v36 = vld [vmem:[%s2474_s22 + $0x221] sm:$0xff]  ;;  %v2025_v37 = vld [vmem:[%s2474_s22 + $0x231] sm:$0xff] }
  0x58   : > { %2245 = vmatpush3.bf16.msra.mxu0 %v1490_v39  ;;  %2160 = vmatprep.mubr.msk.bf16.mxu1 %vm173_vm1, %v550_v38  ;;  %v858_v38 = vpack.c.bf16 %v1921_v36, %v2023_v31  ;;  %v1678_v39 = vpack.c.bf16 %v2025_v37, %v1921_v36 }
  0x59   : > { %2240 = vmatprep.mubr.msk.bf16.mxu0 %vm173_vm1, %v1370_v40  ;;  %2400 = vmatprep.subr.msk.bf16.mxu1 %vm186_vm0, %v1909_v41 }
  0x5a   : > { %2408 = vmatprep.subr.msk.bf16.mxu0 %vm186_vm0, %v2013_v43 }
  0x5e   : > { %2161 = vmatmul.mubr.msk.bf16.gmra.mrb[4].mxu1 %vm173_vm1, %v551_v48 }
  0x5f   : > { %2241 = vmatmul.mubr.msk.bf16.gmra.mrb[4].mxu0 %vm173_vm1, %v1371_v49  ;;  %2166 = vmatprep.mubr.msk.bf16.mxu1 %vm173_vm1, %v651_v50 }
  0x60   : > { %2246 = vmatprep.mubr.msk.bf16.mxu0 %vm173_vm1, %v1471_v51 }
  0x66   : > { %2167 = vmatmul.mubr.msk.bf16.vlgmr.msra.gmra.mrb[0].mxu1 %vm173_vm1, %v652_v55 }
  0x67   : > { %2175 = vmatpush3.bf16.msra.mxu1 %v772_v58  ;;  %2247 = vmatmul.mubr.msk.bf16.vlgmr.msra.gmra.mrb[0].mxu0 %vm173_vm1, %v1472_v57 }
  0x68   : > { %2255 = vmatpush3.bf16.msra.mxu0 %v1592_v60  ;;  %2170 = vmatprep.mubr.msk.bf16.mxu1 %vm173_vm1, %v653_v59 }
  0x69   : > { %2250 = vmatprep.mubr.msk.bf16.mxu0 %vm173_vm1, %v1473_v61  ;;  %2401 = vmatprep.subr.msk.bf16.mxu1 %vm186_vm0, %v1922_v62 }
  0x6a   : > { %2409 = vmatprep.subr.msk.bf16.mxu0 %vm186_vm0, %v2026_v0 }
  0x6e   : > { %2171 = vmatmul.mubr.msk.bf16.gmra.mrb[4].mxu1 %vm173_vm1, %v654_v5 }
  0x6f   : > { %2251 = vmatmul.mubr.msk.bf16.gmra.mrb[4].mxu0 %vm173_vm1, %v1474_v6  ;;  %2176 = vmatprep.mubr.msk.bf16.mxu1 %vm173_vm1, %v753_v7 }
  0x70   : > { %2256 = vmatprep.mubr.msk.bf16.mxu0 %vm173_vm1, %v1573_v8 }
  0x76   : > { %2177 = vmatmul.mubr.msk.bf16.vlgmr.msra.gmra.mrb[0].mxu1 %vm173_vm1, %v754_v12 }
  0x77   : > { %2185 = vmatpush3.bf16.msra.mxu1 %v874_v15  ;;  %2257 = vmatmul.mubr.msk.bf16.vlgmr.msra.gmra.mrb[0].mxu0 %vm173_vm1, %v1574_v14 }
  0x78   : > { %2265 = vmatpush3.bf16.msra.mxu0 %v1694_v17  ;;  %2180 = vmatprep.mubr.msk.bf16.mxu1 %vm173_vm1, %v755_v16 }
  0x79   : > { %2260 = vmatprep.mubr.msk.bf16.mxu0 %vm173_vm1, %v1575_v18 }
  0x7e   : > { %2181 = vmatmul.mubr.msk.bf16.gmra.mrb[4].mxu1 %vm173_vm1, %v756_v24 }
  0x7f   : > { %2261 = vmatmul.mubr.msk.bf16.gmra.mrb[4].mxu0 %vm173_vm1, %v1576_v25  ;;  %2186 = vmatprep.mubr.msk.bf16.mxu1 %vm173_vm1, %v855_v26 }
  0x80   : > { %2266 = vmatprep.mubr.msk.bf16.mxu0 %vm173_vm1, %v1675_v27 }
  0x86   : > { %2187 = vmatmul.mubr.msk.bf16.vlgmr.msra.gmra.mrb[0].mxu1 %vm173_vm1, %v856_v32 }
  0x87   : > { %2267 = vmatmul.mubr.msk.bf16.vlgmr.msra.gmra.mrb[0].mxu0 %vm173_vm1, %v1676_v33  ;;  %2190 = vmatprep.mubr.msk.bf16.mxu1 %vm173_vm1, %v857_v34 }
  0x88   : > { %2270 = vmatprep.mubr.msk.bf16.mxu0 %vm173_vm1, %v1677_v35 }
  0x8e   : > { %2191 = vmatmul.mubr.msk.bf16.gmra.mrb[4].mxu1 %vm173_vm1, %v858_v38 }
  0x8f   : > { %2271 = vmatmul.mubr.msk.bf16.gmra.mrb[4].mxu0 %vm173_vm1, %v1678_v39 }
 0x159   : > { %v2188_v40 = vpop.f32.mrb[0].mxu1 }
 0x15a   : > { %v2268_v41 = vpop.f32.mrb[0].mxu0  ;;  %v910_v42 = vpop.f32.mrb[1].mxu1 }
 0x15b   : > { %v2274_v43 = vadd.f32 %v2268_v41, %v2188_v40  ;;  %v1730_v44 = vpop.f32.mrb[1].mxu0  ;;  %v2189_v45 = vpop.f32.mrb[2].mxu1 }
 0x15c   : > { %v2275_v46 = vadd.f32 %v1730_v44, %v910_v42  ;;  %v2269_v47 = vpop.f32.mrb[2].mxu0  ;;  %v913_v48 = vpop.f32.mrb[3].mxu1 }
 0x15d   : > { %1771 = vst [vmem:[%s2678_s25 + $0x10] sm:$0xff] %v2274_v43  ;;  %v2276_v49 = vadd.f32 %v2269_v47, %v2189_v45  ;;  %v1733_v50 = vpop.f32.mrb[3].mxu0 }
 0x15e   : > { %1769 = vst [vmem:[%s2678_s25] sm:$0xff] %v2275_v46  ;;  %v2277_v51 = vadd.f32 %v1733_v50, %v913_v48 }
 0x15f   : > { %1772 = vst [vmem:[%s2678_s25 + $0x18] sm:$0xff] %v2276_v49 }
 0x160   : > { %1770 = vst [vmem:[%s2678_s25 + $0x8] sm:$0xff] %v2277_v51 }
 0x161   : > { %v2192_v52 = vpop.f32.mrb[4].mxu1 }
 0x162   : > { %v2272_v53 = vpop.f32.mrb[4].mxu0  ;;  %v926_v54 = vpop.f32.mrb[5].mxu1 }
 0x163   : > { %v2278_v55 = vadd.f32 %v2272_v53, %v2192_v52  ;;  %v1746_v56 = vpop.f32.mrb[5].mxu0  ;;  %v2193_v57 = vpop.f32.mrb[6].mxu1 }
 0x164   : > { %v2279_v58 = vadd.f32 %v1746_v56, %v926_v54  ;;  %v2273_v59 = vpop.f32.mrb[6].mxu0  ;;  %v929_v60 = vpop.f32.mrb[7].mxu1 }
 0x165   : > { %1775 = vst [vmem:[%s2678_s25 + $0x30] sm:$0xff] %v2278_v55  ;;  %v2280_v61 = vadd.f32 %v2273_v59, %v2193_v57  ;;  %v1749_v62 = vpop.f32.mrb[7].mxu0 }
 0x166   : > { %1773 = vst [vmem:[%s2678_s25 + $0x20] sm:$0xff] %v2279_v58  ;;  %v2281_v63 = vadd.f32 %v1749_v62, %v929_v60 }
 0x167   : > { %1776 = vst [vmem:[%s2678_s25 + $0x38] sm:$0xff] %v2280_v61 }
 0x168   : > { %1774 = vst [vmem:[%s2678_s25 + $0x28] sm:$0xff] %v2281_v63 }
 0x169 PF: > { %s12_s9 = sadd.s32 1, %s2425_s9  }
 0x16a   : > { %p9_p4 = scmp.ge.s32.totalorder %s12_s9, 4  }
 0x16c   :  { %11 = sbr.rel (!%p9_p4) target bundleno = 1 (0x1), region = 80 }

</bundles_post_ra>
